<compile_context>
chip_gen: v5e
topology: v5e:2x2
jax: 0.10.0
libtpu: 0.0.40
codegen_flags: <defaults>
</compile_context>

<pallas_src>
import functools

import jax
import jax.numpy as jnp
from jax.experimental import pallas as pl
from jax.experimental.pallas import tpu as pltpu


def _cdiv(a, b):
    return -(-a // b)


def _round_up(x, m):
    return ((x + m - 1) // m) * m


# ---------------------------------------------------------------------------
# Kernel
# ---------------------------------------------------------------------------
def _network_kernel(x_ref, p_ref, o_ref, *, out_ch, k1, hidden, lin_in, wcol):
    # x_ref : (TILE_N, K1)   natural batch-major layout (no host transpose)
    # p_ref : packed params, weights in cols [0:wcol), biases in column `wcol`:
    #           rows [0, out_ch)                : conv weight (out_ch, K1) | conv bias
    #           rows [out_ch, out_ch+hidden)    : fc1 weight (hidden, lin_in) | fc1 bias
    #           row  [out_ch+hidden]            : fc2 weight (1, hidden) | fc2 bias
    # o_ref : (1, TILE_N)    batch on the lane dim -> dense, unmasked stores
    x = x_ref[...].astype(jnp.float32)            # bf16 inputs supported; f32 math

    wc = p_ref[0:out_ch, 0:k1]                                       # (3, K1)
    bc = p_ref[0:out_ch, wcol:wcol + 1]                              # (3, 1)
    w1 = p_ref[out_ch:out_ch + hidden, 0:lin_in]                     # (30, 3)
    b1 = p_ref[out_ch:out_ch + hidden, wcol:wcol + 1]                # (30, 1)
    w2 = p_ref[out_ch + hidden:out_ch + hidden + 1, 0:hidden]        # (1, 30)
    b2 = p_ref[out_ch + hidden:out_ch + hidden + 1, wcol:wcol + 1]   # (1, 1)

    # "conv1" == full-window dot product.  Contract on K1 of both operands
    # (i.e. wc @ x^T) so batch lands on the lane dim of the result. -> (3, TILE_N)
    h0 = jax.lax.dot_general(
        wc, x, (((1,), (1,)), ((), ())), preferred_element_type=jnp.float32) + bc
    h0 = jnp.maximum(h0, 0.0)

    # fc1 + ReLU                                                     -> (30, TILE_N)
    h1 = jnp.dot(w1, h0, preferred_element_type=jnp.float32) + b1
    h1 = jnp.maximum(h1, 0.0)

    # fc2 (no activation)                                            -> (1, TILE_N)
    o_ref[...] = jnp.dot(w2, h1, preferred_element_type=jnp.float32) + b2


# ---------------------------------------------------------------------------
# Wrapper
# ---------------------------------------------------------------------------
def _choose_tile(n, tile_n):
    if n <= 128:
        return n                                  # single full-extent block
    t = _round_up(min(tile_n, n), 128)
    t = min(t, _round_up(n, 128))
    # Keep at least 2 grid steps for big batches so 2-TC chips (v7x) use both cores.
    t = min(t, max(128, _round_up(_cdiv(n, 2), 128)))
    return t


def network_forward(x_nchw, packed_params, *, tile_n=32768):
    """x_nchw: (N, 1, seq_len, n_features) -> (N, 1) float32."""
    p, meta = packed_params
    out_ch, k1, hidden, lin_in, wcol = meta
    n = x_nchw.shape[0]
    assert x_nchw.shape[1] * x_nchw.shape[2] * x_nchw.shape[3] == k1

    # Layout-preserving flatten (contiguous reshape == bitcast; no HBM transpose/pad).
    x2d = x_nchw.reshape(n, k1)

    tile = _choose_tile(n, tile_n)
    grid = (_cdiv(n, tile),)

    # VMEM budget: x double-buffer is lane-padded (K1 -> 128 lanes, 512 B/row);
    # ~1.5 KiB/row covers x + out + in-kernel intermediates, plus fixed slack.
    # Capped at 56 MiB so it fits v7x's 64 MiB physical VMEM (v5e/v6e have 128 MiB).
    vmem_limit = min(56 * 1024 * 1024, 8 * 1024 * 1024 + tile * 1536)

    kernel = functools.partial(
        _network_kernel, out_ch=out_ch, k1=k1, hidden=hidden, lin_in=lin_in, wcol=wcol)

    out = pl.pallas_call(
        kernel,
        out_shape=jax.ShapeDtypeStruct((1, n), jnp.float32),
        grid=grid,
        in_specs=[
            # Streamed, double-buffered batch tiles (partial edge block at the tail:
            # garbage rows stay in their own lanes and their stores are masked).
            pl.BlockSpec((tile, k1), lambda i: (i, 0)),
            # Packed weights/biases: single full-extent block, VMEM-resident.
            pl.BlockSpec(p.shape, lambda i: (0, 0)),
        ],
        out_specs=pl.BlockSpec((1, tile), lambda i: (0, i)),
        compiler_params=pltpu.CompilerParams(
            dimension_semantics=("parallel",),
            vmem_limit_bytes=vmem_limit,
        ),
    )(x2d, p)

    # (1, N) -> PyTorch-shaped (N, 1); contiguous reshape, free.
    return out.reshape(n, 1)


# ---------------------------------------------------------------------------
# Parameters
# ---------------------------------------------------------------------------
def make_params(key, sequence_length, n_features):
    """Deterministic synthetic parameters with PyTorch-module shapes."""
    k1, k2, k3, k4, k5, k6 = jax.random.split(key, 6)
    out_ch = 3
    lin_in = out_ch * 1  # full-window conv leaves spatial length 1

    conv_w = jax.random.normal(k1, (out_ch, 1, sequence_length, n_features), jnp.float32) * 0.1
    conv_b = jax.random.normal(k2, (out_ch,), jnp.float32) * 0.1
    fc1_w = jax.random.normal(k3, (30, lin_in), jnp.float32) * 0.1
    fc1_b = jax.random.normal(k4, (30,), jnp.float32) * 0.1
    fc2_w = jax.random.normal(k5, (1, 30), jnp.float32) * 0.1
    fc2_b = jax.random.normal(k6, (1,), jnp.float32) * 0.1
    return dict(conv_w=conv_w, conv_b=conv_b, fc1_w=fc1_w, fc1_b=fc1_b,
                fc2_w=fc2_w, fc2_b=fc2_b)


def pack_params(raw):
    """Pack all weights/biases into one tiny 2-D array (single VMEM-resident block)."""
    conv_w, conv_b = raw["conv_w"], raw["conv_b"]
    fc1_w, fc1_b = raw["fc1_w"], raw["fc1_b"]
    fc2_w, fc2_b = raw["fc2_w"], raw["fc2_b"]

    out_ch = conv_w.shape[0]
    k1 = conv_w.shape[2] * conv_w.shape[3]
    hidden = fc1_w.shape[0]
    lin_in = fc1_w.shape[1]
    wcol = max(k1, hidden, lin_in)          # biases live in column `wcol`

    p = jnp.zeros((out_ch + hidden + 1, wcol + 1), jnp.float32)
    p = p.at[0:out_ch, 0:k1].set(conv_w.reshape(out_ch, k1))
    p = p.at[0:out_ch, wcol].set(conv_b)
    p = p.at[out_ch:out_ch + hidden, 0:lin_in].set(fc1_w)
    p = p.at[out_ch:out_ch + hidden, wcol].set(fc1_b)
    p = p.at[out_ch + hidden, 0:hidden].set(fc2_w[0])
    p = p.at[out_ch + hidden, wcol].set(fc2_b[0])
    return p, (out_ch, k1, hidden, lin_in, wcol)


def reference_forward(x_nchw, raw):
    """Pure-JAX reference with identical semantics (for sanity check)."""
    n = x_nchw.shape[0]
    out_ch = raw["conv_w"].shape[0]
    x = x_nchw.reshape(n, -1)                                            # (N, K1)
    h0 = jnp.maximum(x @ raw["conv_w"].reshape(out_ch, -1).T + raw["conv_b"], 0.0)
    h1 = jnp.maximum(h0 @ raw["fc1_w"].T + raw["fc1_b"], 0.0)
    return h1 @ raw["fc2_w"].T + raw["fc2_b"]                            # (N, 1)


if __name__ == "__main__":
    sequence_length = 3
    n_features = 4

    key = jax.random.PRNGKey(0)
    kx, kp, kx2 = jax.random.split(key, 3)
    raw = make_params(kp, sequence_length, n_features)
    packed = pack_params(raw)

    # Small PyTorch-style NCHW input: single full-extent block path.
    batch = 8
    x = jax.random.normal(kx, (batch, 1, sequence_length, n_features), jnp.float32)
    out = jax.block_until_ready(network_forward(x, packed))
    ref = reference_forward(x, raw)
    assert out.shape == (batch, 1)
    assert jnp.allclose(out, ref, atol=1e-5, rtol=1e-5)

    # Larger batch: multi-step grid with a partial (masked) edge block, no padding.
    batch2 = 300
    x2 = jax.random.normal(kx2, (batch2, 1, sequence_length, n_features), jnp.float32)
    out2 = jax.block_until_ready(network_forward(x2, packed))          # tile -> 256, 2 steps
    ref2 = reference_forward(x2, raw)
    assert out2.shape == (batch2, 1)
    assert jnp.allclose(out2, ref2, atol=1e-5, rtol=1e-5)

    # Explicit small tile to exercise >2 grid steps + masked edge store.
    out3 = jax.block_until_ready(network_forward(x2, packed, tile_n=128))
    assert jnp.allclose(out3, ref2, atol=1e-5, rtol=1e-5)

    print("KERNEL_OK")
</pallas_src>

<mosaic_0001>
module attributes {stable_mosaic.version = 11 : i64} {
  func.func @_network_kernel(%arg0: i32, %arg1: memref<8x12xf32, #tpu.memory_space<vmem>>, %arg2: memref<34x31xf32, #tpu.memory_space<vmem>>, %arg3: memref<1x8xf32, #tpu.memory_space<vmem>>) attributes {dimension_semantics = [#tpu.dimension_semantics<parallel>], iteration_bounds = array<i64: 1>, scalar_prefetch = 0 : i64, scratch_operands = 0 : i64, tpu.core_type = #tpu.core_type<tc>, window_params = [{transform_indices = @transform_0, window_bounds = array<i64: 8, 12>}, {pipeline_mode = #tpu.pipeline_mode<synchronous>, transform_indices = @transform_1, window_bounds = array<i64: 34, 31>}, {transform_indices = @transform_2, window_bounds = array<i64: 1, 8>}]} {
    %c0 = arith.constant 0 : index
    %c0_0 = arith.constant 0 : index
    %0 = vector.load %arg1[%c0, %c0_0] : memref<8x12xf32, #tpu.memory_space<vmem>>, vector<8x12xf32>
    %c0_1 = arith.constant 0 : index
    %c0_2 = arith.constant 0 : index
    %1 = vector.load %arg2[%c0_1, %c0_2] : memref<34x31xf32, #tpu.memory_space<vmem>>, vector<3x12xf32>
    %c0_3 = arith.constant 0 : index
    %c30 = arith.constant 30 : index
    %2 = vector.load %arg2[%c0_3, %c30] : memref<34x31xf32, #tpu.memory_space<vmem>>, vector<3x1xf32>
    %c3 = arith.constant 3 : index
    %c0_4 = arith.constant 0 : index
    %3 = vector.load %arg2[%c3, %c0_4] : memref<34x31xf32, #tpu.memory_space<vmem>>, vector<30x3xf32>
    %c3_5 = arith.constant 3 : index
    %c30_6 = arith.constant 30 : index
    %4 = vector.load %arg2[%c3_5, %c30_6] : memref<34x31xf32, #tpu.memory_space<vmem>>, vector<30x1xf32>
    %c33 = arith.constant 33 : index
    %c0_7 = arith.constant 0 : index
    %5 = vector.load %arg2[%c33, %c0_7] : memref<34x31xf32, #tpu.memory_space<vmem>>, vector<1x30xf32>
    %c33_8 = arith.constant 33 : index
    %c30_9 = arith.constant 30 : index
    %6 = vector.load %arg2[%c33_8, %c30_9] : memref<34x31xf32, #tpu.memory_space<vmem>>, vector<1x1xf32>
    %cst = arith.constant dense<0.000000e+00> : vector<3x8xf32>
    %7 = tpu.matmul %1, %0, %cst {dimension_numbers = #tpu.dot_dimension_numbers<[1], [1], [0], [0], [0, 0, 1, 0], [], []>} : vector<3x12xf32>, vector<8x12xf32>, vector<3x8xf32> -> vector<3x8xf32>
    %8 = vector.broadcast %2 : vector<3x1xf32> to vector<3x8xf32>
    %9 = arith.addf %7, %8 : vector<3x8xf32>
    %cst_10 = arith.constant 0.000000e+00 : f32
    %10 = vector.broadcast %cst_10 : f32 to vector<3x8xf32>
    %11 = arith.maximumf %9, %10 : vector<3x8xf32>
    %cst_11 = arith.constant dense<0.000000e+00> : vector<30x8xf32>
    %12 = tpu.matmul %3, %11, %cst_11 {dimension_numbers = #tpu.dot_dimension_numbers<[1], [0], [0], [1], [0, 0, 1, 1], [], []>} : vector<30x3xf32>, vector<3x8xf32>, vector<30x8xf32> -> vector<30x8xf32>
    %13 = vector.broadcast %4 : vector<30x1xf32> to vector<30x8xf32>
    %14 = arith.addf %12, %13 : vector<30x8xf32>
    %cst_12 = arith.constant 0.000000e+00 : f32
    %15 = vector.broadcast %cst_12 : f32 to vector<30x8xf32>
    %16 = arith.maximumf %14, %15 : vector<30x8xf32>
    %cst_13 = arith.constant dense<0.000000e+00> : vector<1x8xf32>
    %17 = tpu.matmul %5, %16, %cst_13 {dimension_numbers = #tpu.dot_dimension_numbers<[1], [0], [0], [1], [0, 0, 1, 1], [], []>} : vector<1x30xf32>, vector<30x8xf32>, vector<1x8xf32> -> vector<1x8xf32>
    %18 = vector.broadcast %6 : vector<1x1xf32> to vector<1x8xf32>
    %19 = arith.addf %17, %18 : vector<1x8xf32>
    %c0_14 = arith.constant 0 : index
    %c0_15 = arith.constant 0 : index
    %20 = vector.load %arg3[%c0_14, %c0_15] : memref<1x8xf32, #tpu.memory_space<vmem>>, vector<1x8xf32>
    tpu.vector_store %arg3[%c0_14, %c0_15], %19 {strides = array<i32>} : memref<1x8xf32, #tpu.memory_space<vmem>>, vector<1x8xf32>,
    return
  }
  func.func @transform_0(%arg0: i32) -> (i32, i32) {
    %c0_i32 = arith.constant 0 : i32
    %c0_i32_0 = arith.constant 0 : i32
    return %arg0, %c0_i32 : i32, i32
  }
  func.func @transform_1(%arg0: i32) -> (i32, i32) {
    %c0_i32 = arith.constant 0 : i32
    %c0_i32_0 = arith.constant 0 : i32
    %c0_i32_1 = arith.constant 0 : i32
    return %c0_i32, %c0_i32_0 : i32, i32
  }
  func.func @transform_2(%arg0: i32) -> (i32, i32) {
    %c0_i32 = arith.constant 0 : i32
    %c0_i32_0 = arith.constant 0 : i32
    return %c0_i32, %arg0 : i32, i32
  }
}

</mosaic_0001>

<bundles_post_ra>
// kernel: tpu_custom_call.1
= control target key start
LH: loop header
LB: loop body
LE: loop exit
PB: predicated region body
PF: predicated region fallthrough
CT: control target
= control target key end

     0   :  { %vm24_vm0 = vcmask 97280   ;;  %v208_v2 = vmov 30   ;;  %s249_s0 = inlined_call_operand.vmem [shape: f32[8,12], index: 0, kind: input, shape index: {}]   ;;  %s250_s1 = inlined_call_operand.vmem [shape: f32[34,31], index: 1, kind: input, shape index: {}]   ;;  %s251_s2 = inlined_call_operand.hbm [shape: f32[1,8], index: 2, kind: output, shape index: {}]  }
   0x1   :  { %v12_v0 = vld [vmem:[%s249_s0] sm:$0xff]  ;;  %179 = vset.pattern.permute.xlu0 %v208_v2 }
   0x2   :  { %167 = vmatpush.xpose.msk.msra.mxu0 %vm24_vm0, %v12_v0  ;;  %v13_v1 = vld [vmem:[%s250_s1] sm:$0x7] }
   0x3   :  { %7 = vsyncpa [#allocation3], 0  ;;  %21 = vperm.xlu0 %179, %v13_v1   ;;  %180 = vset.pattern.permute.xlu1 %v208_v2  ;;  %v17_v3 = vld [vmem:[%s250_s1 + $0x1b] sm:$0x3f]  ;;  %v16_v4 = vld [vmem:[%s250_s1 + $0x13] sm:$0xff]  ;;  %vm80_vm1 = vcmask 1042432  }
   0x4   :  { %181 = vset.pattern.permute.xlu2 %v208_v2  ;;  %v14_v5 = vld [vmem:[%s250_s1 + $0x3] sm:$0xff]  ;;  %63 = vperm.xlu1 %180, %v16_v4   ;;  %v15_v6 = vld [vmem:[%s250_s1 + $0xb] sm:$0xff]  ;;  %v18_v7 = vld [vmem:[%s250_s1 + $0x21] sm:$0x1]  ;;  %vm71_vm2 = vcmask 23552   ;;  %vm125_vm3 = vcmask 1045504  }
   0x5   :  { %168 = vmatmul.msk.f32.vlgmr.msra.gmra.mxu0 %vm24_vm0, %v13_v1  ;;  %53 = vperm.xlu2 %181, %v14_v5   ;;  %vm122_vm4 = vcmask 244736   ;;  %s209_s1 = smov [#allocation2]   ;;  %s158_s25 = sshll.u32 %s251_s2, 4  ;;  %vm149_vm5 = vcmask 57344   ;;  %s159_s25 = int_to_ptr.hbm [resolvable:$true] %s158_s25 }
   0x6   :  { %s156_s22 = sshll.u32 %s209_s1, 4  ;;  %s157_s22 = int_to_ptr.vmem [resolvable:$true] %s156_s22 }
   0xb   :  { %68 = vperm.xlu0 %179, %v17_v3  }
   0xc   :  { %58 = vperm.xlu1 %180, %v15_v6  }
   0xd   :  { %119 = vperm.xlu2 %181, %v18_v7  }
  0x5f   :  { %v54_v21 = vpop.permute.xlu2 %53 }
  0x67   :  { %v120_v28 = vpop.permute.xlu2 %119 }
  0x75   :  { %v22_v8 = vpop.permute.xlu0 %21 }
  0x76   :  { %v64_v12 = vpop.permute.xlu1 %63 }
  0x7d   :  { %v69_v15 = vpop.permute.xlu0 %68 }
  0x7e   :  { %v59_v16 = vpop.permute.xlu1 %58 }
  0x82   :  { %v47_v9 = vpop.f32.mrf.mxu0 }
  0x83   :  { %v48_v10 = vadd.f32 %v47_v9, %v22_v8 }
  0x85   :  { %v50_v11 = vmax.f32 %v48_v10, 0.0 }
  0x87   :  { %169 = vmatpush.msk.msra.mxu1 %vm80_vm1, %v50_v11  ;;  %176 = vmatpush.msk.msra.mxu3 %vm80_vm1, %v50_v11 }
  0x88   :  { %172 = vmatmul.msk.f32.vlgmr.msra.gmra.mxu3 %vm71_vm2, %v16_v4  ;;  %170 = vmatmul.msk.f32.vlgmr.msra.gmra.mxu1 %vm71_vm2, %v14_v5 }
  0x90   :  { %173 = vmatmul.msk.f32.gmra.mxu3 %vm71_vm2, %v17_v3  ;;  %171 = vmatmul.msk.f32.gmra.mxu1 %vm71_vm2, %v15_v6 }
 0x105   :  { %v101_v13 = vpop.f32.mrf.mxu1 }
 0x106   :  { %v102_v25 = vadd.f32 %v101_v13, %v54_v21 }
 0x108   :  { %v113_v27 = vmax.f32 %v102_v25, 0.0 }
 0x10b   :  { %v107_v14 = vpop.f32.mrf.mxu3 }
 0x10c   :  { %v108_v19 = vadd.f32 %v107_v14, %v64_v12 }
 0x10d   :  { %v104_v17 = vpop.f32.mrf.mxu1 }
 0x10e   :  { %v105_v22 = vadd.f32 %v104_v17, %v59_v16  ;;  %v115_v24 = vmax.f32 %v108_v19, 0.0 }
 0x110   :  { %v114_v26 = vmax.f32 %v105_v22, 0.0 }
 0x113   :  { %v110_v18 = vpop.f32.mrf.mxu3 }
 0x114   :  { %v111_v20 = vadd.f32 %v110_v18, %v69_v15 }
 0x116   :  { %v116_v23 = vmax.f32 %v111_v20, 0.0 }
 0x118   :  { %174 = vmatpush.msk.msra.mxu2 %vm125_vm3, %v116_v23 }
 0x11a   :  { %142 = vmatpush.msra.mxu2 %v115_v24 }
 0x11c   :  { %143 = vmatpush.msra.mxu2 %v114_v26 }
 0x11e   :  { %144 = vmatpush.msra.mxu2 %v113_v27 }
 0x11f   :  { %175 = vmatmul.msk.f32.vlgmr.msra.gmra.mxu2 %vm122_vm4, %v18_v7 }
 0x1a2   :  { %v146_v29 = vpop.f32.mrf.mxu2 }
 0x1a3   :  { %v147_v30 = vadd.f32 %v146_v29, %v120_v28 }
 0x1a5   :  { %150 = vst.msk [vmem:[#allocation2] sm:$0x1] %vm149_vm5, %v147_v30 }
 0x1a6   :  { %161 = dma.vmem_to_hbm [thread:$0]  %s157_s22, 16, %s159_s25, [#allocation3]  }
 0x1a7   :  { %206 = dma.done.wait [#allocation3], 16  }
 0x1a8   :  { %207 = vsyncadd [#allocation3], 4294967280 }
 0x1a9   :  { %166 = vsyncpa [#allocation3], 1 }

</bundles_post_ra>
